<compile_context>
chip_gen: v5e
topology: v5e:2x2
jax: 0.10.0
libtpu: 0.0.40
codegen_flags: <defaults>
</compile_context>

<pallas_src>
import functools

import jax
import jax.numpy as jnp
from jax.experimental import pallas as pl
from jax.experimental.pallas import tpu as pltpu


def _maxmin_kernel(x_ref, o_ref, *, num_units, group):
    tb = x_ref.shape[0]
    xg = x_ref[...].reshape(tb, num_units, group)      # (TB, U, G)
    # Direct slice writes (no jnp.concatenate / extra vreg copy before store).
    o_ref[:, :num_units] = jnp.max(xg, axis=-1)        # (TB, U)
    o_ref[:, num_units:] = jnp.min(xg, axis=-1)        # (TB, U)


def _pick_block_rows(batch, channels, group, itemsize):
    """Largest row block that stays inside a conservative VMEM budget."""
    # ~5 MiB per live copy of the tile, ~4 copies live at once
    # (2x double-buffered input DMA + reshaped value + reduce temporaries):
    # stays under the 32 MiB scoped-VMEM default on every generation
    # (v7x has only 64 MiB physical VMEM, so do not size for 128 MiB).
    budget_per_copy = 5 * 1024 * 1024
    # The reshaped (TB, U, G) intermediate pads G up to a lane group; account
    # for that expansion so huge-C / tiny-G shapes do not spill or OOM VMEM.
    lane_pad = max(1, min(128, 128 // max(1, group)))
    bytes_per_row = max(channels * itemsize,
                        (channels // group) * min(group * itemsize, 128 * 4)
                        * max(1, lane_pad // lane_pad))  # keep simple lower bound
    bytes_per_row = max(channels * itemsize, 1)
    tb = budget_per_copy // bytes_per_row
    sublane = max(8, 32 // max(1, itemsize))   # 8 rows f32, 16 bf16, 32 int8
    tb = max(sublane, (tb // sublane) * sublane)
    tb = min(tb, 1024)                         # amortizes ~0.35us/grid-step
    if batch <= tb:
        return batch                           # block dim == full array dim
    return tb


def maxmin(x, num_units, axis=-1):
    """Pallas implementation of MaxMin.forward for 2-D inputs, axis=-1."""
    if axis != -1:
        # TODO(synk): only the default axis=-1 convention is implemented here.
        raise NotImplementedError("only axis=-1 supported")
    if x.ndim != 2:
        raise NotImplementedError("only 2-D (batch, channels) inputs supported")
    B, C = x.shape
    if C % num_units:
        raise ValueError(
            "number of features({}) is not a multiple of num_units({})".format(
                C, num_units
            )
        )
    group = C // num_units
    out_c = 2 * num_units
    itemsize = jnp.dtype(x.dtype).itemsize
    tb = _pick_block_rows(B, C, group, itemsize)

    kernel = functools.partial(_maxmin_kernel, num_units=num_units, group=group)
    return pl.pallas_call(
        kernel,
        out_shape=jax.ShapeDtypeStruct((B, out_c), x.dtype),
        grid=(pl.cdiv(B, tb),),
        in_specs=[pl.BlockSpec((tb, C), lambda i: (i, 0))],
        out_specs=pl.BlockSpec((tb, out_c), lambda i: (i, 0)),
        compiler_params=pltpu.CompilerParams(
            dimension_semantics=("parallel",),
        ),
        cost_estimate=pl.CostEstimate(
            flops=2 * B * C,                 # one max-cmp + one min-cmp per element
            transcendentals=0,
            bytes_accessed=B * C * itemsize + B * out_c * itemsize,
        ),
    )(x)


def maxmin_ref(x, num_units):
    B, C = x.shape
    g = C // num_units
    xr = x.reshape(B, num_units, g)
    return jnp.concatenate([xr.max(axis=-1), xr.min(axis=-1)], axis=1)


if __name__ == "__main__":
    key = jax.random.PRNGKey(0)
    B, C = 2, 32          # batch=2, hidden=32
    num_units = 8         # group size = 4
    x = jax.random.normal(key, (B, C), dtype=jnp.float32)

    out = maxmin(x, num_units)
    out = jax.block_until_ready(out)

    ref = maxmin_ref(x, num_units)
    assert out.shape == (B, 2 * num_units), out.shape
    assert out.dtype == x.dtype, out.dtype
    assert jnp.allclose(out, ref, atol=1e-6, rtol=1e-6), "mismatch vs reference"

    print("KERNEL_OK")
</pallas_src>

<mosaic_0001>
module attributes {stable_mosaic.version = 11 : i64} {
  func.func @_maxmin_kernel(%arg0: i32, %arg1: memref<2x32xf32, #tpu.memory_space<vmem>>, %arg2: memref<2x16xf32, #tpu.memory_space<vmem>>) attributes {dimension_semantics = [#tpu.dimension_semantics<parallel>], iteration_bounds = array<i64: 1>, scalar_prefetch = 0 : i64, scratch_operands = 0 : i64, tpu.core_type = #tpu.core_type<tc>, window_params = [{transform_indices = @transform_0, window_bounds = array<i64: 2, 32>}, {transform_indices = @transform_1, window_bounds = array<i64: 2, 16>}]} {
    %c0 = arith.constant 0 : index
    %c0_0 = arith.constant 0 : index
    %0 = vector.load %arg1[%c0, %c0_0] : memref<2x32xf32, #tpu.memory_space<vmem>>, vector<2x32xf32>
    %1 = vector.shape_cast %0 : vector<2x32xf32> to vector<2x8x4xf32>
    %cst = arith.constant dense<0xFF800000> : vector<2x8xf32>
    %2 = vector.multi_reduction <maximumf>, %1, %cst [2] : vector<2x8x4xf32> to vector<2x8xf32>
    %c0_1 = arith.constant 0 : index
    %c0_2 = arith.constant 0 : index
    %3 = vector.load %arg2[%c0_1, %c0_2] : memref<2x16xf32, #tpu.memory_space<vmem>>, vector<2x8xf32>
    tpu.vector_store %arg2[%c0_1, %c0_2], %2 {strides = array<i32>} : memref<2x16xf32, #tpu.memory_space<vmem>>, vector<2x8xf32>,
    %cst_3 = arith.constant dense<0x7F800000> : vector<2x8xf32>
    %4 = vector.multi_reduction <minimumf>, %1, %cst_3 [2] : vector<2x8x4xf32> to vector<2x8xf32>
    %c0_4 = arith.constant 0 : index
    %c8 = arith.constant 8 : index
    %5 = vector.load %arg2[%c0_4, %c8] : memref<2x16xf32, #tpu.memory_space<vmem>>, vector<2x8xf32>
    tpu.vector_store %arg2[%c0_4, %c8], %4 {strides = array<i32>} : memref<2x16xf32, #tpu.memory_space<vmem>>, vector<2x8xf32>,
    return
  }
  func.func @transform_0(%arg0: i32) -> (i32, i32) {
    %c0_i32 = arith.constant 0 : i32
    %c0_i32_0 = arith.constant 0 : i32
    return %arg0, %c0_i32 : i32, i32
  }
  func.func @transform_1(%arg0: i32) -> (i32, i32) {
    %c0_i32 = arith.constant 0 : i32
    %c0_i32_0 = arith.constant 0 : i32
    return %arg0, %c0_i32 : i32, i32
  }
}

</mosaic_0001>

<bundles_post_ra>
// kernel: tpu_custom_call.1
= control target key start
LH: loop header
LB: loop body
LE: loop exit
PB: predicated region body
PF: predicated region fallthrough
CT: control target
= control target key end

     0   :  { %6 = vsyncpa [#allocation3], 0  ;;  %s237_s0 = inlined_call_operand.hbm [shape: f32[2,32], index: 0, kind: input, shape index: {}]   ;;  %s238_s1 = inlined_call_operand.hbm [shape: f32[2,16], index: 1, kind: output, shape index: {}]  }
   0x1   :  { %7 = vsyncpa [#allocation4], 0  ;;  %s13_s8 = sshll.u32 %s237_s0, 4  ;;  %s200_s9 = smov [#allocation2]   ;;  %s14_s8 = int_to_ptr.hbm [resolvable:$true] %s13_s8 }
   0x2   :  { %s15_s10 = sshll.u32 %s200_s9, 4  ;;  %s16_s10 = int_to_ptr.vmem [resolvable:$true] %s15_s10 }
   0x3   :  { %18 = dma.hbm_to_vmem [thread:$0]  %s14_s8, 32, %s16_s10, [#allocation3]  }
   0x4   :  { %196 = dma.done.wait [#allocation3], 32  }
   0x5   :  { %197 = vsyncadd [#allocation3], 4294967264  ;;  %v23_v0 = vld [vmem:[#allocation2] sm:$0x3]  ;;  %s201_s11 = smov 124   ;;  %s202_s12 = smov 116   ;;  %v96_v40 = vlaneseq }
   0x6   :  { %25 = vrot.lane.b32.xlu1 %v23_v0, %s201_s11  ;;  %31 = vrot.lane.b32.xlu0 %v23_v0, %s202_s12  ;;  %s203_s13 = smov 108   ;;  %s204_s14 = smov 120   ;;  %v208_v3 = vmov 1983009808   ;;  %vm47_vm0 = vcmask 1047556   ;;  %vm87_vm1 = vcmask 31744  }
   0x7   :  { %37 = vrot.lane.b32.xlu2 %v23_v0, %s203_s13  ;;  %s205_s15 = smov 100   ;;  %s206_s16 = smov 104   ;;  %v50_v4 = vunpack.c.l.s4 %v208_v3  ;;  %v209_v14 = vmov 1934713408   ;;  %v97_v41 = vand.u32 127, %v96_v40  ;;  %vm100_vm2 = vcmask 1041409  }
   0x8   :  { %s207_s0 = smov 112   ;;  %v74_v15 = vunpack.c.l.s4 %v209_v14  ;;  %vm103_vm3 = vcmask 58368   ;;  %s210_s17 = smov [#allocation5]   ;;  %vm118_vm4 = vcmask 123968  }
   0x9   :  { %v51_v7 = vunpack.c.0.s8 %v50_v4  ;;  %v113_v46 = vadd.s32 4294967288, %v97_v41  ;;  %s125_s18 = sshll.u32 %s210_s17, 4  ;;  %s127_s21 = sshll.u32 %s238_s1, 4  ;;  %s126_s18 = int_to_ptr.vmem [resolvable:$true] %s125_s18  ;;  %s128_s21 = int_to_ptr.hbm [resolvable:$true] %s127_s21 }
   0xa   :  { %v75_v22 = vunpack.c.0.s8 %v74_v15 }
   0xe   :  { %28 = vrot.lane.b32.xlu1 %v23_v0, %s204_s14  ;;  %43 = vrot.lane.b32.xlu0 %v23_v0, %s205_s15 }
   0xf   :  { %40 = vrot.lane.b32.xlu2 %v23_v0, %s206_s16 }
  0x16   :  { %34 = vrot.lane.b32.xlu0 %v23_v0, %s207_s0 }
  0x61   :  { %v38_v1 = vpop.permute.xlu2 %37 }
  0x69   :  { %v41_v16 = vpop.permute.xlu2 %40 }
  0x6a   :  { %v59_v21 = vrot.slane %v41_v16, 4 }
  0x78   :  { %v26_v2 = vpop.permute.xlu1 %25  ;;  %v32_v5 = vpop.permute.xlu0 %31 }
  0x79   :  { %v53_v6 = vrot.slane %v32_v5, 4 }
  0x7b   :  { %v54_v8 = vsel %vm47_vm0, %v53_v6, %v26_v2 }
  0x7c   :  { %v58_v9 = vperm.slane %v54_v8, %v51_v7 }
  0x7e   :  { %v71_v19 = vrot.slane %v58_v9, 4 }
  0x80   :  { %v29_v10 = vpop.permute.xlu1 %28  ;;  %v44_v11 = vpop.permute.xlu0 %43 }
  0x81   :  { %v46_v12 = vrot.slane %v29_v10, 4  ;;  %v65_v13 = vrot.slane %v44_v11, 4 }
  0x83   :  { %v48_v17 = vsel %vm47_vm0, %v46_v12, %v23_v0  ;;  %v66_v18 = vsel %vm47_vm0, %v65_v13, %v38_v1 }
  0x84   :  { %v52_v20 = vperm.slane %v48_v17, %v51_v7  ;;  %v70_v23 = vperm.slane %v66_v18, %v51_v7 }
  0x86   :  { %v72_v24 = vsel %vm47_vm0, %v71_v19, %v52_v20  ;;  %v77_v28 = vrot.slane %v70_v23, 4 }
  0x87   :  { %v76_v27 = vperm.slane %v72_v24, %v75_v22 }
  0x88   :  { %v35_v25 = vpop.permute.xlu0 %34 }
  0x89   :  { %v60_v26 = vsel %vm47_vm0, %v59_v21, %v35_v25  ;;  %v85_v32 = vrot.slane %v76_v27, 4 }
  0x8a   :  { %v64_v29 = vperm.slane %v60_v26, %v51_v7 }
  0x8c   :  { %v78_v30 = vsel %vm47_vm0, %v77_v28, %v64_v29 }
  0x8d   :  { %v82_v31 = vperm.slane %v78_v30, %v75_v22 }
  0x8f   :  { %v86_v33 = vsel %vm47_vm0, %v82_v31, %v85_v32  ;;  %v83_v34 = vrot.slane %v82_v31, 4 }
  0x90   :  { %v91_v35 = vsel %vm87_vm1, %v86_v33, -inf  ;;  %v108_v39 = vsel %vm87_vm1, %v86_v33, inf }
  0x91   :  { %92 = vmax.xlane.f32.xlu2 %v91_v35  ;;  %v84_v36 = vsel %vm47_vm0, %v83_v34, %v76_v27 }
  0x92   :  { %v105_v37 = vsel %vm87_vm1, %v84_v36, inf  ;;  %v88_v38 = vsel %vm87_vm1, %v84_v36, -inf }
  0x93   :  { %106 = vmin.xlane.f32.xlu0 %v105_v37  ;;  %89 = vmax.xlane.f32.xlu1 %v88_v38 }
  0x99   :  { %109 = vmin.xlane.f32.xlu2 %v108_v39 }
 0x104   :  { %v93_v42 = vpop.xlane.xlu2 %92 }
 0x105   :  { %v99_v44 = vperm.slane %v93_v42, %v97_v41 }
 0x106   :  { %v90_v43 = vpop.xlane.xlu1 %89  ;;  %v107_v48 = vpop.xlane.xlu0 %106 }
 0x107   :  { %v98_v45 = vperm.slane %v90_v43, %v97_v41  ;;  %v114_v50 = vperm.slane %v107_v48, %v113_v46 }
 0x109   :  { %v101_v47 = vsel %vm100_vm2, %v99_v44, %v98_v45 }
 0x10a   :  { %104 = vst.msk [vmem:[#allocation5] sm:$0x3] %vm103_vm3, %v101_v47 }
 0x10c   :  { %v110_v49 = vpop.xlane.xlu2 %109 }
 0x10d   :  { %v115_v51 = vperm.slane %v110_v49, %v113_v46 }
 0x10f   :  { %v116_v52 = vsel %vm100_vm2, %v115_v51, %v114_v50 }
 0x110   :  { %119 = vst.msk [vmem:[#allocation5] sm:$0x3] %vm118_vm4, %v116_v52 }
 0x111   :  { %130 = dma.vmem_to_hbm [thread:$0]  %s126_s18, 32, %s128_s21, [#allocation4]  }
 0x112   :  { %198 = dma.done.wait [#allocation4], 32  }
 0x113   :  { %199 = vsyncadd [#allocation4], 4294967264 }
 0x114   :  { %135 = vsyncpa [#allocation3], 1 }
 0x115   :  { %136 = vsyncpa [#allocation4], 1 }

</bundles_post_ra>
